<compile_context>
chip_gen: v6e
topology: v6e:2x2x1
jax: 0.10.0
libtpu: 0.0.40
codegen_flags: <defaults>
</compile_context>

<pallas_src>
import functools

import jax
import jax.numpy as jnp
from jax.experimental import pallas as pl
from jax.experimental.pallas import tpu as pltpu

_EPS = 1e-07


def _round_up(x, m):
    return ((x + m - 1) // m) * m


def _device_info():
    """Best-effort chip-generation probe (VMEM budget + TensorCore count)."""
    kind = ""
    try:
        kind = jax.devices()[0].device_kind.lower()
    except Exception:
        pass
    is_v7 = "7" in kind
    return {
        "is_v7": is_v7,
        # v7x: 64 MiB VMEM per TensorCore; v5e / v6e: 128 MiB.
        "vmem_limit_cap": (48 << 20) if is_v7 else (96 << 20),
        "block_budget_bytes": (4 << 20) if is_v7 else (8 << 20),
        "num_tensorcores": 2 if is_v7 else 1,
    }


# ---------------------------------------------------------------------------
# Streaming path: read every class column (small / medium num_classes).
# ---------------------------------------------------------------------------
def _cce_stream_kernel(labels_ref, ypred_ref, weight_ref, loss_ref, wsum_ref,
                       *, n_rows):
    c = pl.program_id(0)                    # TensorCore-split axis
    i = pl.program_id(1)                    # row-tile (reduction) axis
    tiles_per_core = pl.num_programs(1)

    @pl.when(i == 0)
    def _():
        loss_ref[...] = jnp.zeros_like(loss_ref)
        wsum_ref[...] = jnp.zeros_like(wsum_ref)

    yp = ypred_ref[...]                     # (tn, C), native dtype
    labels = labels_ref[...]                # (tn, 1) int32
    tn, num_classes = yp.shape

    # Select the true-class probability: iota compare + lane reduce.
    class_ids = jax.lax.broadcasted_iota(jnp.int32, (tn, num_classes), 1)
    sel = jnp.where(class_ids == labels, yp, jnp.zeros_like(yp))
    p_sel = jnp.sum(sel, axis=-1, keepdims=True).astype(jnp.float32)  # (tn,1)

    # Row validity: tail rows of the last tile and clamp-duplicated overflow
    # tiles (from rounding the per-core tile count up) contribute nothing.
    tile_idx = c * tiles_per_core + i
    row_ids = jax.lax.broadcasted_iota(jnp.int32, (tn, 1), 0)
    valid = (tile_idx * tn + row_ids) < n_rows

    p_clip = (1.0 - 2.0 * _EPS) * p_sel + _EPS
    p_safe = jnp.where(valid, p_clip, 1.0)          # padded rows -> log(1) = 0
    loss_n = -jnp.log(p_safe)                       # tn EUP ops, not tn*C

    w = jnp.where(valid, weight_ref[...].astype(jnp.float32), 0.0)

    # Per-tile scalar partials (XLU sublane reduce) accumulated into the
    # lane-dense resident (1, 8, 128) output block; every element holds the
    # same running total, the wrapper reads element [c, 0, 0].
    partial_loss = jnp.sum(loss_n * w, axis=0, keepdims=True)   # (1, 1)
    partial_w = jnp.sum(w, axis=0, keepdims=True)               # (1, 1)
    loss_ref[...] = loss_ref[...] + partial_loss
    wsum_ref[...] = wsum_ref[...] + partial_w


def _pick_stream_tile_n(n_rows, num_classes, dtype, block_budget_bytes):
    """Largest row tile whose y_pred block stays under the byte budget."""
    itemsize = jnp.dtype(dtype).itemsize
    # Sublane packing: 8 rows per vreg for 32-bit, 16 for bf16, 32 for int8.
    row_mult = 8 * max(1, 4 // max(1, itemsize))
    padded_c = _round_up(max(num_classes, 1), 128)   # VMEM lane padding
    bytes_per_row = padded_c * itemsize
    t = (block_budget_bytes // bytes_per_row) // row_mult * row_mult
    t = max(row_mult, t)
    if t >= n_rows:
        return n_rows                                # single full-height block
    return t


def _cce_loss_stream(labels, y_pred, weight, *, tile_n, num_cores, info):
    n, num_classes = y_pred.shape
    itemsize = jnp.dtype(y_pred.dtype).itemsize

    n_tiles = pl.cdiv(n, tile_n)
    num_cores = max(1, min(num_cores, n_tiles))
    tiles_per_core = pl.cdiv(n_tiles, num_cores)

    def row_map(c, i):
        # Clamp so the rounded-up per-core tile count never indexes past the
        # array; the kernel masks duplicated / tail rows to zero.  (Costs one
        # re-read of the last tile when num_cores does not divide n_tiles.)
        return (jnp.minimum(c * tiles_per_core + i, n_tiles - 1), 0)

    def out_map(c, i):
        return (c, 0, 0)                   # resident across the reduction axis

    if num_cores > 1 and info["is_v7"]:
        # Guarantee real 2-TC sharding on v7x.
        dims = (getattr(pltpu, "CORE_PARALLEL", pltpu.PARALLEL), pltpu.ARBITRARY)
    else:
        dims = ("parallel", "arbitrary")

    block_bytes = tile_n * _round_up(num_classes, 128) * itemsize
    vmem_limit = int(min(info["vmem_limit_cap"],
                         max(32 << 20, 2 * block_bytes + (4 << 20))))

    cost = pl.CostEstimate(
        flops=3 * n * num_classes,
        transcendentals=n,
        bytes_accessed=(n * _round_up(num_classes, 128) * itemsize
                        + 12 * n + num_cores * 8 * 128 * 8),
    )

    kernel = functools.partial(_cce_stream_kernel, n_rows=n)

    loss_part, wsum_part = pl.pallas_call(
        kernel,
        out_shape=(
            jax.ShapeDtypeStruct((num_cores, 8, 128), jnp.float32),
            jax.ShapeDtypeStruct((num_cores, 8, 128), jnp.float32),
        ),
        grid_spec=pltpu.PrefetchScalarGridSpec(
            num_scalar_prefetch=0,
            grid=(num_cores, tiles_per_core),
            in_specs=[
                pl.BlockSpec((tile_n, 1), row_map),             # labels
                pl.BlockSpec((tile_n, num_classes), row_map),   # y_pred
                pl.BlockSpec((tile_n, 1), row_map),             # weight
            ],
            out_specs=[
                pl.BlockSpec((1, 8, 128), out_map),             # weighted loss
                pl.BlockSpec((1, 8, 128), out_map),             # weight sum
            ],
        ),
        compiler_params=pltpu.CompilerParams(
            dimension_semantics=dims,
            vmem_limit_bytes=vmem_limit,
        ),
        cost_estimate=cost,
    )(labels, y_pred, weight)

    return jnp.sum(loss_part[:, 0, 0]) / jnp.sum(wsum_part[:, 0, 0])


# ---------------------------------------------------------------------------
# Gather path: large class counts -> fetch only the label's class block.
# ---------------------------------------------------------------------------
def _cce_gather_kernel(blk_ref, col_ref, weight_ref, ypred_hbm,
                       loss_ref, wsum_ref, gbuf, sem,
                       *, n_rows, tile_n, cls_blk):
    i = pl.program_id(0)
    n_tiles = pl.num_programs(0)

    def issue(tile_idx, slot):
        base = tile_idx * tile_n

        @pl.loop(0, tile_n)
        def _(r):
            row = jnp.minimum(base + r, n_rows - 1)      # clamp tail rows
            blk = blk_ref[row]                           # SMEM scalar read
            pltpu.make_async_copy(
                ypred_hbm.at[row, blk],                  # (cls_blk,) in HBM
                gbuf.at[slot, r],                        # (cls_blk,) in VMEM
                sem.at[slot]).start()

    def wait_all(slot):
        # All copies in a slot have identical shape; wait once per issued copy
        # with a representative descriptor (paged-attention pattern).
        @pl.loop(0, tile_n)
        def _(r):
            pltpu.make_async_copy(ypred_hbm.at[0, 0], gbuf.at[slot, 0],
                                  sem.at[slot]).wait()

    @pl.when(i == 0)
    def _():
        loss_ref[...] = jnp.zeros_like(loss_ref)
        wsum_ref[...] = jnp.zeros_like(wsum_ref)
        issue(0, 0)                                      # prime slot 0

    @pl.when(i + 1 < n_tiles)                            # prefetch next tile
    def _():
        issue(i + 1, (i + 1) & 1)

    slot = i & 1
    wait_all(slot)

    yp = gbuf[slot]                                      # (tile_n, cls_blk)
    cols = col_ref[...]                                  # (tile_n, 1) int32
    lane_ids = jax.lax.broadcasted_iota(jnp.int32, (tile_n, cls_blk), 1)
    sel = jnp.where(lane_ids == cols, yp, jnp.zeros_like(yp))
    p_sel = jnp.sum(sel, axis=-1, keepdims=True).astype(jnp.float32)

    row_ids = jax.lax.broadcasted_iota(jnp.int32, (tile_n, 1), 0)
    valid = (i * tile_n + row_ids) < n_rows

    p_clip = (1.0 - 2.0 * _EPS) * p_sel + _EPS
    p_safe = jnp.where(valid, p_clip, 1.0)
    loss_n = -jnp.log(p_safe)

    w = jnp.where(valid, weight_ref[...].astype(jnp.float32), 0.0)

    partial_loss = jnp.sum(loss_n * w, axis=0, keepdims=True)
    partial_w = jnp.sum(w, axis=0, keepdims=True)
    loss_ref[...] = loss_ref[...] + partial_loss
    wsum_ref[...] = wsum_ref[...] + partial_w


def _cce_loss_gather(labels, y_pred, weight, *, cls_blk, tile_n, info):
    n, num_classes = y_pred.shape
    itemsize = jnp.dtype(y_pred.dtype).itemsize

    lab = labels[:, 0]
    blk_idx = (lab // cls_blk).astype(jnp.int32)          # (N,) scalar prefetch
    col_in_blk = (lab % cls_blk).astype(jnp.int32).reshape(n, 1)
    # Free row-major reshape so the gather DMA indexes whole leading dims.
    ypred3d = y_pred.reshape(n, num_classes // cls_blk, cls_blk)
    # TODO(synk): for very large N, chunk blk_idx (SMEM capacity) and shard the
    # gather grid across the two v7x TensorCores.

    n_tiles = pl.cdiv(n, tile_n)

    gbuf_bytes = 2 * tile_n * cls_blk * itemsize
    vmem_limit = int(min(info["vmem_limit_cap"],
                         max(32 << 20, 2 * gbuf_bytes + (4 << 20))))

    cost = pl.CostEstimate(
        flops=3 * n * cls_blk,
        transcendentals=n,
        bytes_accessed=n * cls_blk * itemsize + 16 * n + 2 * 8 * 128 * 4,
    )

    kernel = functools.partial(_cce_gather_kernel, n_rows=n, tile_n=tile_n,
                               cls_blk=cls_blk)

    loss_part, wsum_part = pl.pallas_call(
        kernel,
        out_shape=(
            jax.ShapeDtypeStruct((8, 128), jnp.float32),
            jax.ShapeDtypeStruct((8, 128), jnp.float32),
        ),
        grid_spec=pltpu.PrefetchScalarGridSpec(
            num_scalar_prefetch=1,
            grid=(n_tiles,),
            in_specs=[
                pl.BlockSpec((tile_n, 1), lambda i, blk: (i, 0)),   # col in blk
                pl.BlockSpec((tile_n, 1), lambda i, blk: (i, 0)),   # weight
                pl.BlockSpec(memory_space=pl.ANY),                  # y_pred HBM
            ],
            out_specs=[
                pl.BlockSpec((8, 128), lambda i, blk: (0, 0)),
                pl.BlockSpec((8, 128), lambda i, blk: (0, 0)),
            ],
            scratch_shapes=[
                pltpu.VMEM((2, tile_n, cls_blk), y_pred.dtype),
                pltpu.SemaphoreType.DMA((2,)),
            ],
        ),
        compiler_params=pltpu.CompilerParams(
            dimension_semantics=("arbitrary",),
            vmem_limit_bytes=vmem_limit,
        ),
        cost_estimate=cost,
    )(blk_idx, col_in_blk, weight, ypred3d)

    return loss_part[0, 0] / wsum_part[0, 0]


# ---------------------------------------------------------------------------
# Public entry point.
# ---------------------------------------------------------------------------
def cce_loss(y_true, y_pred, weight, *, tile_n=None, num_cores=None,
             gather_min_classes=2048):
    """Weighted categorical cross-entropy, matching CCE_loss.forward."""
    n, num_classes = y_pred.shape
    labels = y_true[:, :1].astype(jnp.int32)      # only column 0 is used
    weight = weight.reshape(n, 1)
    info = _device_info()

    use_gather = (num_classes >= gather_min_classes
                  and num_classes % 128 == 0
                  and tile_n is None and num_cores is None)
    if use_gather:
        cls_blk = (512 if num_classes % 512 == 0 else
                   256 if num_classes % 256 == 0 else 128)
        g_tile = n if n <= 256 else 256           # rows gathered per grid step
        return _cce_loss_gather(labels, y_pred, weight, cls_blk=cls_blk,
                                tile_n=g_tile, info=info)

    if tile_n is None:
        tile_n = _pick_stream_tile_n(n, num_classes, y_pred.dtype,
                                     info["block_budget_bytes"])
    if num_cores is None:
        num_cores = info["num_tensorcores"]
    return _cce_loss_stream(labels, y_pred, weight, tile_n=tile_n,
                            num_cores=num_cores, info=info)


def cce_loss_ref(y_true, y_pred, weight, num_classes):
    yp = (1.0 - 2.0 * _EPS) * y_pred.astype(jnp.float32) + _EPS
    onehot = jnp.eye(num_classes, dtype=yp.dtype)[y_true[:, 0]]
    loss_n = -jnp.sum(onehot * jnp.log(yp), axis=-1).reshape(-1, 1)
    return jnp.sum(loss_n * weight) / jnp.sum(weight)


if __name__ == "__main__":
    key = jax.random.PRNGKey(0)

    def make_inputs(k, n, c):
        k1, k2, k3 = jax.random.split(k, 3)
        y_true = jax.random.randint(k1, (n, 1), 0, c, dtype=jnp.int32)
        logits = jax.random.normal(k2, (n, c), dtype=jnp.float32)
        y_pred = jax.nn.softmax(logits, axis=-1)
        weight = jax.random.uniform(k3, (n, 1), dtype=jnp.float32,
                                    minval=0.5, maxval=2.0)
        return y_true, y_pred, weight

    ka, kb, kc = jax.random.split(key, 3)

    # 1) Small streaming case (single tile).
    yt, yp, w = make_inputs(ka, 16, 8)
    out = jax.block_until_ready(cce_loss(yt, yp, w))
    ref = jax.block_until_ready(cce_loss_ref(yt, yp, w, 8))
    assert jnp.allclose(out, ref, rtol=1e-5, atol=1e-5), ("stream", out, ref)

    # 2) Multi-tile streaming with tail masking and a forced 2-way core split
    #    (exercises the clamped overflow tile and the row masks).
    yt, yp, w = make_inputs(kb, 20, 8)
    out = jax.block_until_ready(cce_loss(yt, yp, w, tile_n=8, num_cores=2))
    ref = jax.block_until_ready(cce_loss_ref(yt, yp, w, 8))
    assert jnp.allclose(out, ref, rtol=1e-5, atol=1e-5), ("masked", out, ref)

    # 3) Large class count -> scalar-prefetch / manual-DMA gather path.
    yt, yp, w = make_inputs(kc, 64, 2048)
    out = jax.block_until_ready(cce_loss(yt, yp, w))
    ref = jax.block_until_ready(cce_loss_ref(yt, yp, w, 2048))
    assert jnp.allclose(out, ref, rtol=1e-5, atol=1e-5), ("gather", out, ref)

    print("KERNEL_OK")
</pallas_src>

<mosaic_0001>
module attributes {stable_mosaic.version = 11 : i64} {
  func.func @_cce_stream_kernel(%arg0: i32, %arg1: i32, %arg2: memref<16x1xi32, #tpu.memory_space<vmem>>, %arg3: memref<16x8xf32, #tpu.memory_space<vmem>>, %arg4: memref<16x1xf32, #tpu.memory_space<vmem>>, %arg5: memref<1x8x128xf32, #tpu.memory_space<vmem>>, %arg6: memref<1x8x128xf32, #tpu.memory_space<vmem>>) attributes {dimension_semantics = [#tpu.dimension_semantics<parallel>, #tpu.dimension_semantics<arbitrary>], iteration_bounds = array<i64: 1, 1>, scalar_prefetch = 0 : i64, scratch_operands = 0 : i64, tpu.core_type = #tpu.core_type<tc>, window_params = [{transform_indices = @transform_0, window_bounds = array<i64: 16, 1>}, {transform_indices = @transform_1, window_bounds = array<i64: 16, 8>}, {transform_indices = @transform_2, window_bounds = array<i64: 16, 1>}, {transform_indices = @transform_3, window_bounds = array<i64: 1, 8, 128>}, {transform_indices = @transform_4, window_bounds = array<i64: 1, 8, 128>}]} {
    %c0_i32 = arith.constant 0 : i32
    %0 = arith.cmpi eq, %arg1, %c0_i32 : i32
    %1 = arith.extui %0 : i1 to i32
    %c0_i32_0 = arith.constant 0 : i32
    %2 = arith.cmpi ne, %1, %c0_i32_0 : i32
    scf.if %2 {
      %cst_27 = arith.constant 0.000000e+00 : f32
      %47 = vector.broadcast %cst_27 : f32 to vector<1x8x128xf32>
      %c0_28 = arith.constant 0 : index
      %c0_29 = arith.constant 0 : index
      %c0_30 = arith.constant 0 : index
      %48 = vector.load %arg5[%c0_28, %c0_29, %c0_30] : memref<1x8x128xf32, #tpu.memory_space<vmem>>, vector<1x8x128xf32>
      tpu.vector_store %arg5[%c0_28, %c0_29, %c0_30], %47 {strides = array<i32>} : memref<1x8x128xf32, #tpu.memory_space<vmem>>, vector<1x8x128xf32>,
      %cst_31 = arith.constant 0.000000e+00 : f32
      %49 = vector.broadcast %cst_31 : f32 to vector<1x8x128xf32>
      %c0_32 = arith.constant 0 : index
      %c0_33 = arith.constant 0 : index
      %c0_34 = arith.constant 0 : index
      %50 = vector.load %arg6[%c0_32, %c0_33, %c0_34] : memref<1x8x128xf32, #tpu.memory_space<vmem>>, vector<1x8x128xf32>
      tpu.vector_store %arg6[%c0_32, %c0_33, %c0_34], %49 {strides = array<i32>} : memref<1x8x128xf32, #tpu.memory_space<vmem>>, vector<1x8x128xf32>,
    } else {
    }
    %c0 = arith.constant 0 : index
    %c0_1 = arith.constant 0 : index
    %3 = vector.load %arg3[%c0, %c0_1] : memref<16x8xf32, #tpu.memory_space<vmem>>, vector<16x8xf32>
    %c0_2 = arith.constant 0 : index
    %c0_3 = arith.constant 0 : index
    %4 = vector.load %arg2[%c0_2, %c0_3] : memref<16x1xi32, #tpu.memory_space<vmem>>, vector<16x1xi32>
    %5 = tpu.iota {dimensions = array<i32: 1>} : vector<16x8xi32>
    %6 = vector.broadcast %4 : vector<16x1xi32> to vector<16x8xi32>
    %7 = arith.cmpi eq, %5, %6 : vector<16x8xi32>
    %cst = arith.constant 0.000000e+00 : f32
    %8 = vector.broadcast %cst : f32 to vector<16x8xf32>
    %9 = arith.select %7, %3, %8 : vector<16x8xi1>, vector<16x8xf32>
    %cst_4 = arith.constant dense<0.000000e+00> : vector<16xf32>
    %10 = vector.multi_reduction <add>, %9, %cst_4 [1] : vector<16x8xf32> to vector<16xf32>
    %11 = vector.shape_cast %10 : vector<16xf32> to vector<16x1xf32>
    %c1_i32 = arith.constant 1 : i32
    %12 = arith.muli %arg0, %c1_i32 : i32
    %13 = arith.addi %12, %arg1 : i32
    %14 = tpu.iota {dimensions = array<i32: 0>} : vector<16x1xi32>
    %c16_i32 = arith.constant 16 : i32
    %15 = arith.muli %13, %c16_i32 : i32
    %16 = vector.broadcast %15 : i32 to vector<16x1xi32>
    %17 = arith.addi %16, %14 : vector<16x1xi32>
    %c16_i32_5 = arith.constant 16 : i32
    %18 = vector.broadcast %c16_i32_5 : i32 to vector<16x1xi32>
    %19 = arith.cmpi slt, %17, %18 : vector<16x1xi32>
    %cst_6 = arith.constant 0.999999821 : f32
    %20 = vector.broadcast %cst_6 : f32 to vector<16x1xf32>
    %21 = arith.mulf %20, %11 : vector<16x1xf32>
    %cst_7 = arith.constant 1.000000e-07 : f32
    %22 = vector.broadcast %cst_7 : f32 to vector<16x1xf32>
    %23 = arith.addf %21, %22 : vector<16x1xf32>
    %cst_8 = arith.constant 1.000000e+00 : f32
    %24 = vector.broadcast %cst_8 : f32 to vector<16x1xf32>
    %25 = arith.select %19, %23, %24 : vector<16x1xi1>, vector<16x1xf32>
    %26 = math.log %25 : vector<16x1xf32>
    %cst_9 = arith.constant 0.000000e+00 : f32
    %27 = vector.broadcast %cst_9 : f32 to vector<16x1xf32>
    %28 = arith.subf %27, %26 : vector<16x1xf32>
    %c0_10 = arith.constant 0 : index
    %c0_11 = arith.constant 0 : index
    %29 = vector.load %arg4[%c0_10, %c0_11] : memref<16x1xf32, #tpu.memory_space<vmem>>, vector<16x1xf32>
    %cst_12 = arith.constant 0.000000e+00 : f32
    %30 = vector.broadcast %cst_12 : f32 to vector<16x1xf32>
    %31 = arith.select %19, %29, %30 : vector<16x1xi1>, vector<16x1xf32>
    %32 = arith.mulf %28, %31 : vector<16x1xf32>
    %cst_13 = arith.constant dense<0.000000e+00> : vector<1xf32>
    %33 = vector.multi_reduction <add>, %32, %cst_13 [0] : vector<16x1xf32> to vector<1xf32>
    %34 = vector.shape_cast %33 : vector<1xf32> to vector<1x1xf32>
    %cst_14 = arith.constant dense<0.000000e+00> : vector<1xf32>
    %35 = vector.multi_reduction <add>, %31, %cst_14 [0] : vector<16x1xf32> to vector<1xf32>
    %36 = vector.shape_cast %35 : vector<1xf32> to vector<1x1xf32>
    %c0_15 = arith.constant 0 : index
    %c0_16 = arith.constant 0 : index
    %c0_17 = arith.constant 0 : index
    %37 = vector.load %arg5[%c0_15, %c0_16, %c0_17] : memref<1x8x128xf32, #tpu.memory_space<vmem>>, vector<1x8x128xf32>
    %38 = vector.shape_cast %34 : vector<1x1xf32> to vector<1x1x1xf32>
    %39 = vector.broadcast %38 : vector<1x1x1xf32> to vector<1x8x128xf32>
    %40 = arith.addf %37, %39 : vector<1x8x128xf32>
    %c0_18 = arith.constant 0 : index
    %c0_19 = arith.constant 0 : index
    %c0_20 = arith.constant 0 : index
    %41 = vector.load %arg5[%c0_18, %c0_19, %c0_20] : memref<1x8x128xf32, #tpu.memory_space<vmem>>, vector<1x8x128xf32>
    tpu.vector_store %arg5[%c0_18, %c0_19, %c0_20], %40 {strides = array<i32>} : memref<1x8x128xf32, #tpu.memory_space<vmem>>, vector<1x8x128xf32>,
    %c0_21 = arith.constant 0 : index
    %c0_22 = arith.constant 0 : index
    %c0_23 = arith.constant 0 : index
    %42 = vector.load %arg6[%c0_21, %c0_22, %c0_23] : memref<1x8x128xf32, #tpu.memory_space<vmem>>, vector<1x8x128xf32>
    %43 = vector.shape_cast %36 : vector<1x1xf32> to vector<1x1x1xf32>
    %44 = vector.broadcast %43 : vector<1x1x1xf32> to vector<1x8x128xf32>
    %45 = arith.addf %42, %44 : vector<1x8x128xf32>
    %c0_24 = arith.constant 0 : index
    %c0_25 = arith.constant 0 : index
    %c0_26 = arith.constant 0 : index
    %46 = vector.load %arg6[%c0_24, %c0_25, %c0_26] : memref<1x8x128xf32, #tpu.memory_space<vmem>>, vector<1x8x128xf32>
    tpu.vector_store %arg6[%c0_24, %c0_25, %c0_26], %45 {strides = array<i32>} : memref<1x8x128xf32, #tpu.memory_space<vmem>>, vector<1x8x128xf32>,
    return
  }
  func.func @transform_0(%arg0: i32, %arg1: i32) -> (i32, i32) {
    %c1_i32 = arith.constant 1 : i32
    %0 = arith.muli %arg0, %c1_i32 : i32
    %1 = arith.addi %0, %arg1 : i32
    %c0_i32 = arith.constant 0 : i32
    %2 = arith.minsi %1, %c0_i32 : i32
    %c0_i32_0 = arith.constant 0 : i32
    %c0_i32_1 = arith.constant 0 : i32
    return %2, %c0_i32_0 : i32, i32
  }
  func.func @transform_1(%arg0: i32, %arg1: i32) -> (i32, i32) {
    %c1_i32 = arith.constant 1 : i32
    %0 = arith.muli %arg0, %c1_i32 : i32
    %1 = arith.addi %0, %arg1 : i32
    %c0_i32 = arith.constant 0 : i32
    %2 = arith.minsi %1, %c0_i32 : i32
    %c0_i32_0 = arith.constant 0 : i32
    %c0_i32_1 = arith.constant 0 : i32
    return %2, %c0_i32_0 : i32, i32
  }
  func.func @transform_2(%arg0: i32, %arg1: i32) -> (i32, i32) {
    %c1_i32 = arith.constant 1 : i32
    %0 = arith.muli %arg0, %c1_i32 : i32
    %1 = arith.addi %0, %arg1 : i32
    %c0_i32 = arith.constant 0 : i32
    %2 = arith.minsi %1, %c0_i32 : i32
    %c0_i32_0 = arith.constant 0 : i32
    %c0_i32_1 = arith.constant 0 : i32
    return %2, %c0_i32_0 : i32, i32
  }
  func.func @transform_3(%arg0: i32, %arg1: i32) -> (i32, i32, i32) {
    %c0_i32 = arith.constant 0 : i32
    %c0_i32_0 = arith.constant 0 : i32
    %c0_i32_1 = arith.constant 0 : i32
    return %arg0, %c0_i32, %c0_i32_0 : i32, i32, i32
  }
  func.func @transform_4(%arg0: i32, %arg1: i32) -> (i32, i32, i32) {
    %c0_i32 = arith.constant 0 : i32
    %c0_i32_0 = arith.constant 0 : i32
    %c0_i32_1 = arith.constant 0 : i32
    return %arg0, %c0_i32, %c0_i32_0 : i32, i32, i32
  }
}

</mosaic_0001>

<bundles_post_ra>
// kernel: tpu_custom_call.1
= control target key start
LH: loop header
LB: loop body
LE: loop exit
PB: predicated region body
PF: predicated region fallthrough
CT: control target
= control target key end

     0   :  { %10 = vsyncpa [#allocation3], 0  ;;  %v306_v1 = vmov 0   ;;  %s362_s0 = inlined_call_operand.vmem [shape: s32[16,1], index: 0, kind: input, shape index: {}]   ;;  %s363_s1 = inlined_call_operand.vmem [shape: f32[16,8], index: 1, kind: input, shape index: {}]   ;;  %s364_s2 = inlined_call_operand.vmem [shape: f32[16,1], index: 2, kind: input, shape index: {}]   ;;  %s365_s3 = inlined_call_operand.hbm [shape: f32[1,8,128], index: 3, kind: output, shape index: {0}]   ;;  %s366_s4 = inlined_call_operand.hbm [shape: f32[1,8,128], index: 4, kind: output, shape index: {1}]  }
   0x1   :  { %v122_v0 = vld [vmem:[%s362_s0] sm:$0xff]  ;;  %256 = vset.pattern.permute.xlu0 %v306_v1  ;;  %257 = vset.pattern.permute.xlu1 %v306_v1 }
   0x2   :  { %11 = vsyncpa [#allocation5], 0  ;;  %127 = vperm.xlu0 %256, %v122_v0   ;;  %v123_v2 = vld [vmem:[%s362_s0 + $0x8] sm:$0xff]  ;;  %v124_v3 = vlaneseq  ;;  %v120_v5 = vld [vmem:[%s363_s1] sm:$0xff]  ;;  %vm136_vm0 = vcmask 64512   ;;  %vm171_vm3 = vcmask 7168  }
   0x3   :  { %v121_v9 = vld [vmem:[%s363_s1 + $0x8] sm:$0xff]  ;;  %v165_v13 = vld [vmem:[%s364_s2] sm:$0xff]  ;;  %s307_s1 = smov [#allocation4]  }
   0x4   :  { %v125_v4 = vand.u32 127, %v124_v3  ;;  %v166_v14 = vld [vmem:[%s364_s2 + $0x8] sm:$0xff]  ;;  %v181_v15 = vsel %vm171_vm3, %v165_v13, 0.0  ;;  %s222_s2 = sshll.u32 %s307_s1, 4  ;;  %s223_s2 = int_to_ptr.vmem [resolvable:$true] %s222_s2 }
   0x5   :  { %v182_v16 = vsel %vm171_vm3, %v166_v14, 0.0  ;;  %s262_s26 = scalar_lea.vmem %s223_s2, 128  ;;  %p267_p1 = scmp.lt.s32.totalorder %s223_s2, %s223_s2 }
   0x6   :  { %130 = vperm.xlu0 %256, %v123_v2   ;;  %v183_v17 = vadd.f32 %v182_v16, %v181_v15  ;;  %p263_p0 = scmp.ne.s32.totalorder %s223_s2, %s262_s26  ;;  %p268_p2 = scmp.lt.s32.totalorder %s262_s26, %s262_s26 }
   0x8   :  { %v184_v18 = vrot.slane %v183_v17, 4  ;;  %p269_p3 = por %p268_p2, %p267_p1 }
   0xa   :  { %v185_v19 = vadd.f32 %v184_v18, %v183_v17  ;;  %p270_p4 = pnand %p269_p3, %p263_p0 }
   0xc   :  { %v186_v20 = vrot.slane %v185_v19, 2 }
   0xe   :  { %v187_v21 = vadd.f32 %v186_v20, %v185_v19 }
  0x10   :  { %v188_v22 = vrot.slane %v187_v21, 1 }
  0x12   :  { %v189_v23 = vadd.f32 %v188_v22, %v187_v21 }
  0x7d   :  { %v128_v6 = vpop.permute.xlu0 %127 }
  0x7e   :  { %vm132_vm1 = vcmp.eq.s32.totalorder %v125_v4, %v128_v6 }
  0x7f   :  { %v134_v7 = vsel %vm132_vm1, %v120_v5, 0.0 }
  0x80   :  { %v137_v8 = vsel %vm136_vm0, %v134_v7, 0.0 }
  0x81   :  { %v131_v10 = vpop.permute.xlu0 %130  ;;  %138 = vadd.xlane.f32.xlu1 %v137_v8 }
  0x82   :  { %vm133_vm2 = vcmp.eq.s32.totalorder %v125_v4, %v131_v10 }
  0x83   :  { %v135_v11 = vsel %vm133_vm2, %v121_v9, 0.0 }
  0x84   :  { %v140_v12 = vsel %vm136_vm0, %v135_v11, 0.0 }
  0x85   :  { %141 = vadd.xlane.f32.xlu1 %v140_v12 }
  0x96   :  { %201 = vperm.xlu1 %257, %v189_v23  }
 0x10a   :  { %v139_v24 = vpop.xlane.xlu1 %138 }
 0x10b   :  { %v153_v25 = vmul.f32 0.9999998, %v139_v24 }
 0x10d   :  { %v155_v26 = vadd.f32 1e-07, %v153_v25 }
 0x10e   :  { %v142_v27 = vpop.xlane.xlu1 %141 }
 0x10f   :  { %258 = vlog2.f32 %v155_v26  ;;  %v154_v28 = vmul.f32 0.9999998, %v142_v27 }
 0x111   :  { %v156_v29 = vadd.f32 1e-07, %v154_v28 }
 0x112   :  { %v202_v45 = vpop.permute.xlu1 %201 }
 0x113   :  { %260 = vlog2.f32 %v156_v29  ;;  %205 = vst [vmem:[#allocation4] sm:$0xff] %v202_v45 }
 0x11c   :  { %v259_v30 = vpop.eup %258 }
 0x11d   :  { %v160_v31 = vmul.f32 0.6931472, %v259_v30 }
 0x11f   :  { %v163_v32 = vsub.f32 0.0, %v160_v31 }
 0x120   :  { %v261_v33 = vpop.eup %260 }
 0x121   :  { %v162_v34 = vmul.f32 0.6931472, %v261_v33  ;;  %v169_v35 = vmul.f32 %v165_v13, %v163_v32 }
 0x123   :  { %v164_v36 = vsub.f32 0.0, %v162_v34  ;;  %v172_v38 = vsel %vm171_vm3, %v169_v35, 0.0 }
 0x125   :  { %v170_v37 = vmul.f32 %v166_v14, %v164_v36 }
 0x127   :  { %v173_v39 = vsel %vm171_vm3, %v170_v37, 0.0 }
 0x128   :  { %v174_v40 = vadd.f32 %v173_v39, %v172_v38 }
 0x12a   :  { %v175_v41 = vrot.slane %v174_v40, 4 }
 0x12c   :  { %v176_v42 = vadd.f32 %v175_v41, %v174_v40 }
 0x12e   :  { %v177_v43 = vrot.slane %v176_v42, 2 }
 0x130   :  { %v178_v44 = vadd.f32 %v177_v43, %v176_v42 }
 0x132   :  { %v179_v46 = vrot.slane %v178_v44, 1 }
 0x134   :  { %v180_v47 = vadd.f32 %v179_v46, %v178_v44 }
 0x135   :  { %273 = shalt.err (!%p270_p4)
}
 0x136   :  { %225 = dma.vmem_to_hbm [thread:$0]  %s223_s2, 128, %s366_s4, [#allocation5]   ;;  %193 = vperm.xlu0 %256, %v180_v47  }
 0x137   :  { %s308_s29 = smov [#allocation2]  }
 0x138   :  { %s212_s30 = sshll.u32 %s308_s29, 4  ;;  %s213_s30 = int_to_ptr.vmem [resolvable:$true] %s212_s30 }
 0x139   :  { %s282_s5 = scalar_lea.vmem %s213_s30, 128  ;;  %p287_p6 = scmp.lt.s32.totalorder %s213_s30, %s213_s30 }
 0x13a   :  { %p283_p5 = scmp.ne.s32.totalorder %s213_s30, %s282_s5  ;;  %p288_p7 = scmp.lt.s32.totalorder %s282_s5, %s282_s5 }
 0x13c   :  { %p289_p8 = por %p288_p7, %p287_p6 }
 0x13e   :  { %p290_p9 = pnand %p289_p8, %p283_p5 }
 0x1b1   :  { %v194_v48 = vpop.permute.xlu0 %193 }
 0x1b2   :  { %197 = vst [vmem:[#allocation2] sm:$0xff] %v194_v48 }
 0x1b3   :  { %293 = shalt.err (!%p290_p9)
}
 0x1b4   :  { %215 = dma.vmem_to_hbm [thread:$0]  %s213_s30, 128, %s365_s3, [#allocation3]  }
 0x1b5   :  { %302 = dma.done.wait [#allocation3], 128  }
 0x1b6   :  { %303 = vsyncadd [#allocation3], 4294967168 }
 0x1b7   :  { %304 = dma.done.wait [#allocation5], 128  }
 0x1b8   :  { %305 = vsyncadd [#allocation5], 4294967168 }
 0x1b9   :  { %232 = vsyncpa [#allocation3], 1 }
 0x1ba   :  { %233 = vsyncpa [#allocation5], 1 }

</bundles_post_ra>
